<compile_context>
chip_gen: v6e
topology: v6e:2x2x1
jax: 0.10.0
libtpu: 0.0.40
codegen_flags: <defaults>
</compile_context>

<pallas_src>
import jax
import jax.numpy as jnp
from jax.experimental import pallas as pl
from jax.experimental.pallas import tpu as pltpu


def _tpu_kind():
    try:
        return jax.devices()[0].device_kind.lower()
    except Exception:
        return ""


def _vmem_limit_bytes(kind):
    """Per-generation scoped-VMEM limit (physical: v7x 64 MiB, v4/v5/v6 128 MiB)."""
    if "v7" in kind:
        return 48 * 1024 * 1024      # leave headroom under v7x's 64 MiB
    if any(v in kind for v in ("v4", "v5", "v6")):
        return 96 * 1024 * 1024      # default scoped limit (16/32 MiB) is far below physical
    return 48 * 1024 * 1024          # unknown chip: fits every generation's physical VMEM


def _pick_block_batch(B, S, U, G, vmem_limit_bytes, *, min_grid_steps=1):
    """Batch rows per grid step, sized against the real per-step VMEM footprint.

    Per batch row one grid step touches:
      * the bf16 es tile                 S*U*2  (double-buffered -> x2)
      * the f32 e_proj intermediate      S*U*4
      * the f32 tanh(h) intermediate     S*U*4
      * the f32 es*attn context temp     S*U*4
      * the f32 ctx/attn/scores outputs  (U+2S)*4 (double-buffered -> x2)
      * the bf16 [ds|g] row              (U+G)*2 (double-buffered -> x2)
    Resident weights (w_e^T, [w_d^T;w_g^T], b_g, V) are subtracted from the
    budget up front (counted double-buffered as the worst case).
    """
    row_bytes = (S * U * (2 * 2 + 4 + 4 + 4)
                 + (U + 2 * S) * 4 * 2
                 + (U + G) * 2 * 2)
    weight_bytes = ((U * U + (U + G) * U) * 2 + 2 * U * 4) * 2
    budget = (vmem_limit_bytes * 3) // 4 - weight_bytes
    if budget <= row_bytes:
        raise ValueError(
            f"BahdanauAttention tile does not fit VMEM (S={S}, U={U}, G={G}); "
            "reduce sequence length / units or raise vmem_limit_bytes")
    max_rows = budget // row_bytes
    target = min(max_rows, max(1, B // max(min_grid_steps, 1)))
    if target >= B:
        return B
    # Largest multiple-of-8 divisor of B that is <= target (keeps every block
    # (8, 128)-legal when TB < B).  Hard-error instead of silently using TB=B.
    tb = min(B - B % 8, target - target % 8)
    while tb >= 8 and B % tb:
        tb -= 8
    if tb >= 8 and B % tb == 0:
        return tb
    raise ValueError(
        f"no VMEM-feasible batch tile for B={B}, S={S}, U={U} "
        f"(need a multiple-of-8 divisor of B that is <= {target}); "
        "pass block_batch explicitly")


def bahdanau_attention(ds, es, g, wd, we, wg, bg, vw, *, block_batch=None):
    """ds:(B,1,U) es:(B,S,U) g:(B,G). Weights in PyTorch Linear layout:
       wd,we:(U,U)  wg:(U,G)  bg:(U,)  vw:(1,U)."""
    B, S, U = es.shape
    G = g.shape[-1]
    assert ds.shape == (B, 1, U) and g.shape == (B, G)

    kind = _tpu_kind()
    vmem_limit = _vmem_limit_bytes(kind)
    # bf16 EUP/VPU exists on v6e/v7x; keep the post-matmul math in f32 elsewhere.
    act_bf16 = ("v6" in kind) or ("v7" in kind)
    # v7x has two TensorCores: force >= 2 "parallel" grid steps so the batch
    # axis can be sharded across both cores (no-op on single-TC v5e/v6e).
    min_steps = 2 if ("v7" in kind and B >= 16) else 1

    # Streamed / MXU operands in bf16 (f32 accumulation inside the kernel).
    # In a real pipeline the encoder output would already live in bf16; here the
    # cast is a one-off convert in the wrapper.
    dsg = jnp.concatenate([ds.reshape(B, U), g], axis=-1).astype(jnp.bfloat16)  # (B, U+G)
    wdg_t = jnp.concatenate([wd.T, wg.T], axis=0).astype(jnp.bfloat16)          # (U+G, U)
    we_t = we.T.astype(jnp.bfloat16)                                            # (U, U)
    es_flat = es.reshape(B * S, U).astype(jnp.bfloat16)                         # (B*S, U)
    bg2 = bg.reshape(1, U).astype(jnp.float32)                                  # (1, U)
    vw2 = vw.reshape(1, U).astype(jnp.float32)                                  # (1, U)

    TB = (_pick_block_batch(B, S, U, G, vmem_limit, min_grid_steps=min_steps)
          if block_batch is None else block_batch)
    assert B % TB == 0 and (TB == B or TB % 8 == 0)
    grid = (B // TB,)

    def kernel(dsg_ref, es_ref, we_ref, wdg_ref, bg_ref, vw_ref,
               ctx_ref, attn_ref, scores_ref):
        es2 = es_ref[...]                                          # (TB*S, U) bf16

        # Encoder projection: one bf16 MXU matmul with M = TB*S, f32 accumulate.
        e_proj = jnp.dot(es2, we_ref[...],
                         preferred_element_type=jnp.float32)       # (TB*S, U) f32

        # Fused decoder-state + gate projection (+ bias in f32): (TB,U+G)@(U+G,U).
        dg_proj = jnp.dot(dsg_ref[...], wdg_ref[...],
                          preferred_element_type=jnp.float32) + bg_ref[...]  # (TB, U)

        # Broadcast per-batch-row projection over the S encoder positions.
        pre = e_proj.reshape(TB, S, U) + dg_proj[:, None, :]       # (TB, S, U) f32
        v = vw_ref[...]                                            # (1, U) f32
        if act_bf16:
            # bf16 tanh (EUP) + bf16 V-multiply (VPU) on v6e/v7x; the U
            # lane-reduction accumulates in f32.
            h = jnp.tanh(pre.astype(jnp.bfloat16))
            s = jnp.sum((h * v.astype(jnp.bfloat16)[None, :, :]).astype(jnp.float32),
                        axis=-1)                                   # (TB, S)
        else:
            h = jnp.tanh(pre)
            s = jnp.sum(h * v[None, :, :], axis=-1)                # (TB, S)

        # Softmax over the sequence (lane) axis; approx reciprocal on the EUP
        # plus one Newton step (rows sum to 1 only to ~f32 accuracy, not exactly).
        m = jnp.max(s, axis=-1, keepdims=True)
        p = jnp.exp(s - m)
        denom = jnp.sum(p, axis=-1, keepdims=True)
        inv = pl.reciprocal(denom, approx=True)
        inv = inv * (2.0 - denom * inv)
        attn = p * inv                                             # (TB, S) f32

        # Context: f32 weighted sum over S (sublane reduce), no per-batch bmm.
        # For small/moderate S the lane->sublane relayout of attn is acceptable;
        # for very long sequences a segmented-sublane softmax (attn born
        # (TB*S, 1)) would remove the XLU transpose.
        es3 = es2.reshape(TB, S, U).astype(jnp.float32)
        ctx = jnp.sum(es3 * attn[:, :, None], axis=1)              # (TB, U)

        scores_ref[...] = s.astype(scores_ref.dtype)
        attn_ref[...] = attn.astype(attn_ref.dtype)
        ctx_ref[...] = ctx.astype(ctx_ref.dtype)

    # Grid-invariant operands: single-buffer them when the extra pipeline buffer
    # costs real VMEM (>= 1 MiB of weights); for tiny weights the default
    # double-buffering is harmless.
    weight_vmem = (we_t.size + wdg_t.size) * 2
    resident_mode = pl.Buffered(1) if weight_vmem >= (1 << 20) else None

    def _resident(shape):
        if resident_mode is None:
            return pl.BlockSpec(shape, lambda i: (0, 0))
        return pl.BlockSpec(shape, lambda i: (0, 0), pipeline_mode=resident_mode)

    # Outputs as lane-dense 2-D slabs.  NOTE: for production shapes with
    # S, U >= 128 these are fully lane-dense; at tiny shapes (S=8, U=32) the
    # stores are necessarily masked and plain XLA would be competitive.
    out_shapes = (
        jax.ShapeDtypeStruct((B, U), jnp.float32),   # context
        jax.ShapeDtypeStruct((B, S), jnp.float32),   # attention distribution
        jax.ShapeDtypeStruct((B, S), jnp.float32),   # scores (transposed logits)
    )

    grid_spec = pltpu.PrefetchScalarGridSpec(
        num_scalar_prefetch=0,
        grid=grid,
        in_specs=[
            pl.BlockSpec((TB, U + G), lambda i: (i, 0)),      # [ds | g]      (bf16)
            pl.BlockSpec((TB * S, U), lambda i: (i, 0)),      # es, flattened (bf16)
            _resident((U, U)),                                # w_e^T         (bf16, resident)
            _resident((U + G, U)),                            # [w_d^T;w_g^T] (bf16, resident)
            _resident((1, U)),                                # b_g           (f32)
            _resident((1, U)),                                # V row         (f32)
        ],
        out_specs=[
            pl.BlockSpec((TB, U), lambda i: (i, 0)),          # context
            pl.BlockSpec((TB, S), lambda i: (i, 0)),          # attention
            pl.BlockSpec((TB, S), lambda i: (i, 0)),          # scores
        ],
    )

    ctx2, attn2, scores2 = pl.pallas_call(
        kernel,
        out_shape=out_shapes,
        grid_spec=grid_spec,
        compiler_params=pltpu.CompilerParams(
            # "parallel" shards the batch axis across both v7x TensorCores.
            dimension_semantics=("parallel",),
            vmem_limit_bytes=vmem_limit,
        ),
    )(dsg, es_flat, we_t, wdg_t, bg2, vw2)

    # Back to the PyTorch output shapes.
    return ctx2.reshape(B, 1, U), attn2.reshape(B, 1, S), scores2.reshape(B, 1, S)


def _reference(ds, es, g, wd, we, wg, bg, vw):
    # Pure-JAX (f32) mirror of the PyTorch forward, for verification.
    g3 = g[:, None, :]
    pre = jnp.tanh(ds @ wd.T + es @ we.T + (g3 @ wg.T + bg))   # (B, S, U)
    scores = pre @ vw.T                                         # (B, S, 1)
    scores = jnp.swapaxes(scores, 2, 1)                         # (B, 1, S)
    attn = jax.nn.softmax(scores, axis=2)
    ctx = attn @ es                                             # (B, 1, U)
    return ctx, attn, scores


if __name__ == "__main__":
    B, S, U, G = 2, 8, 32, 16   # batch, encoder seq len, units, max_encoder_seq_length

    key = jax.random.PRNGKey(0)
    k_ds, k_es, k_g, k_wd, k_we, k_wg, k_bg, k_v = jax.random.split(key, 8)

    ds = jax.random.normal(k_ds, (B, 1, U), jnp.float32)
    es = jax.random.normal(k_es, (B, S, U), jnp.float32)
    g = jax.random.normal(k_g, (B, G), jnp.float32)

    # Deterministic synthetic parameters, PyTorch Linear layout (out_features, in_features).
    scale = 1.0 / jnp.sqrt(jnp.float32(U))
    wd = jax.random.uniform(k_wd, (U, U), jnp.float32, -scale, scale)
    we = jax.random.uniform(k_we, (U, U), jnp.float32, -scale, scale)
    wg = jax.random.uniform(k_wg, (U, G), jnp.float32, -scale, scale)
    bg = jax.random.uniform(k_bg, (U,), jnp.float32, -scale, scale)
    vw = jax.random.uniform(k_v, (1, U), jnp.float32, -scale, scale)

    ctx, attn, scores = bahdanau_attention(ds, es, g, wd, we, wg, bg, vw)
    jax.block_until_ready((ctx, attn, scores))

    ctx_r, attn_r, scores_r = _reference(ds, es, g, wd, we, wg, bg, vw)
    assert ctx.shape == (B, 1, U) and attn.shape == (B, 1, S) and scores.shape == (B, 1, S)
    # bf16 streamed operands (and bf16 tanh on v6e/v7x) vs the pure-f32
    # reference: tolerances are loosened accordingly.
    assert jnp.allclose(scores, scores_r, atol=5e-2, rtol=5e-2), \
        float(jnp.max(jnp.abs(scores - scores_r)))
    assert jnp.allclose(attn, attn_r, atol=3e-2, rtol=3e-2), \
        float(jnp.max(jnp.abs(attn - attn_r)))
    assert jnp.allclose(ctx, ctx_r, atol=5e-2, rtol=5e-2), \
        float(jnp.max(jnp.abs(ctx - ctx_r)))

    print("KERNEL_OK")
</pallas_src>

<mosaic_0001>
module attributes {stable_mosaic.version = 11 : i64} {
  func.func @kernel(%arg0: i32, %arg1: memref<2x48xbf16, #tpu.memory_space<vmem>>, %arg2: memref<16x32xbf16, #tpu.memory_space<vmem>>, %arg3: memref<32x32xbf16, #tpu.memory_space<vmem>>, %arg4: memref<48x32xbf16, #tpu.memory_space<vmem>>, %arg5: memref<1x32xf32, #tpu.memory_space<vmem>>, %arg6: memref<1x32xf32, #tpu.memory_space<vmem>>, %arg7: memref<2x32xf32, #tpu.memory_space<vmem>>, %arg8: memref<2x8xf32, #tpu.memory_space<vmem>>, %arg9: memref<2x8xf32, #tpu.memory_space<vmem>>) attributes {dimension_semantics = [#tpu.dimension_semantics<parallel>], iteration_bounds = array<i64: 1>, scalar_prefetch = 0 : i64, scratch_operands = 0 : i64, tpu.core_type = #tpu.core_type<tc>, window_params = [{transform_indices = @transform_0, window_bounds = array<i64: 2, 48>}, {transform_indices = @transform_1, window_bounds = array<i64: 16, 32>}, {pipeline_mode = #tpu.pipeline_mode<synchronous>, transform_indices = @transform_2, window_bounds = array<i64: 32, 32>}, {pipeline_mode = #tpu.pipeline_mode<synchronous>, transform_indices = @transform_3, window_bounds = array<i64: 48, 32>}, {pipeline_mode = #tpu.pipeline_mode<synchronous>, transform_indices = @transform_4, window_bounds = array<i64: 1, 32>}, {pipeline_mode = #tpu.pipeline_mode<synchronous>, transform_indices = @transform_5, window_bounds = array<i64: 1, 32>}, {transform_indices = @transform_6, window_bounds = array<i64: 2, 32>}, {transform_indices = @transform_7, window_bounds = array<i64: 2, 8>}, {transform_indices = @transform_8, window_bounds = array<i64: 2, 8>}]} {
    %c0 = arith.constant 0 : index
    %c0_0 = arith.constant 0 : index
    %0 = vector.load %arg2[%c0, %c0_0] : memref<16x32xbf16, #tpu.memory_space<vmem>>, vector<16x32xbf16>
    %c0_1 = arith.constant 0 : index
    %c0_2 = arith.constant 0 : index
    %1 = vector.load %arg3[%c0_1, %c0_2] : memref<32x32xbf16, #tpu.memory_space<vmem>>, vector<32x32xbf16>
    %cst = arith.constant dense<0.000000e+00> : vector<16x32xf32>
    %2 = tpu.matmul %0, %1, %cst {dimension_numbers = #tpu.dot_dimension_numbers<[1], [0], [0], [1], [0, 0, 1, 1], [], []>} : vector<16x32xbf16>, vector<32x32xbf16>, vector<16x32xf32> -> vector<16x32xf32>
    %c0_3 = arith.constant 0 : index
    %c0_4 = arith.constant 0 : index
    %3 = vector.load %arg1[%c0_3, %c0_4] : memref<2x48xbf16, #tpu.memory_space<vmem>>, vector<2x48xbf16>
    %c0_5 = arith.constant 0 : index
    %c0_6 = arith.constant 0 : index
    %4 = vector.load %arg4[%c0_5, %c0_6] : memref<48x32xbf16, #tpu.memory_space<vmem>>, vector<48x32xbf16>
    %cst_7 = arith.constant dense<0.000000e+00> : vector<2x32xf32>
    %5 = tpu.matmul %3, %4, %cst_7 {dimension_numbers = #tpu.dot_dimension_numbers<[1], [0], [0], [1], [0, 0, 1, 1], [], []>} : vector<2x48xbf16>, vector<48x32xbf16>, vector<2x32xf32> -> vector<2x32xf32>
    %c0_8 = arith.constant 0 : index
    %c0_9 = arith.constant 0 : index
    %6 = vector.load %arg5[%c0_8, %c0_9] : memref<1x32xf32, #tpu.memory_space<vmem>>, vector<1x32xf32>
    %7 = vector.broadcast %6 : vector<1x32xf32> to vector<2x32xf32>
    %8 = arith.addf %5, %7 : vector<2x32xf32>
    %9 = vector.shape_cast %2 : vector<16x32xf32> to vector<2x8x32xf32>
    %10 = vector.shape_cast %8 : vector<2x32xf32> to vector<2x1x32xf32>
    %11 = vector.broadcast %10 : vector<2x1x32xf32> to vector<2x8x32xf32>
    %12 = arith.addf %9, %11 : vector<2x8x32xf32>
    %c0_10 = arith.constant 0 : index
    %c0_11 = arith.constant 0 : index
    %13 = vector.load %arg6[%c0_10, %c0_11] : memref<1x32xf32, #tpu.memory_space<vmem>>, vector<1x32xf32>
    %14 = math.tanh %12 : vector<2x8x32xf32>
    %15 = vector.shape_cast %13 : vector<1x32xf32> to vector<1x1x32xf32>
    %16 = vector.broadcast %15 : vector<1x1x32xf32> to vector<2x8x32xf32>
    %17 = arith.mulf %14, %16 : vector<2x8x32xf32>
    %cst_12 = arith.constant dense<0.000000e+00> : vector<2x8xf32>
    %18 = vector.multi_reduction <add>, %17, %cst_12 [2] : vector<2x8x32xf32> to vector<2x8xf32>
    %cst_13 = arith.constant dense<0xFF800000> : vector<2xf32>
    %19 = vector.multi_reduction <maximumf>, %18, %cst_13 [1] : vector<2x8xf32> to vector<2xf32>
    %20 = vector.shape_cast %19 : vector<2xf32> to vector<2x1xf32>
    %21 = vector.broadcast %20 : vector<2x1xf32> to vector<2x8xf32>
    %22 = arith.subf %18, %21 : vector<2x8xf32>
    %23 = math.exp %22 : vector<2x8xf32>
    %cst_14 = arith.constant dense<0.000000e+00> : vector<2xf32>
    %24 = vector.multi_reduction <add>, %23, %cst_14 [1] : vector<2x8xf32> to vector<2xf32>
    %25 = vector.shape_cast %24 : vector<2xf32> to vector<2x1xf32>
    %26 = tpu.reciprocal %25 {approx = true} : vector<2x1xf32> -> vector<2x1xf32>
    %27 = arith.mulf %25, %26 : vector<2x1xf32>
    %cst_15 = arith.constant 2.000000e+00 : f32
    %28 = vector.broadcast %cst_15 : f32 to vector<2x1xf32>
    %29 = arith.subf %28, %27 : vector<2x1xf32>
    %30 = arith.mulf %26, %29 : vector<2x1xf32>
    %31 = vector.broadcast %30 : vector<2x1xf32> to vector<2x8xf32>
    %32 = arith.mulf %23, %31 : vector<2x8xf32>
    %33 = vector.shape_cast %0 : vector<16x32xbf16> to vector<2x8x32xbf16>
    %34 = arith.extf %33 : vector<2x8x32xbf16> to vector<2x8x32xf32>
    %35 = vector.shape_cast %32 : vector<2x8xf32> to vector<2x8x1xf32>
    %36 = vector.broadcast %35 : vector<2x8x1xf32> to vector<2x8x32xf32>
    %37 = arith.mulf %34, %36 : vector<2x8x32xf32>
    %cst_16 = arith.constant dense<0.000000e+00> : vector<2x32xf32>
    %38 = vector.multi_reduction <add>, %37, %cst_16 [1] : vector<2x8x32xf32> to vector<2x32xf32>
    %c0_17 = arith.constant 0 : index
    %c0_18 = arith.constant 0 : index
    %39 = vector.load %arg9[%c0_17, %c0_18] : memref<2x8xf32, #tpu.memory_space<vmem>>, vector<2x8xf32>
    tpu.vector_store %arg9[%c0_17, %c0_18], %18 {strides = array<i32>} : memref<2x8xf32, #tpu.memory_space<vmem>>, vector<2x8xf32>,
    %c0_19 = arith.constant 0 : index
    %c0_20 = arith.constant 0 : index
    %40 = vector.load %arg8[%c0_19, %c0_20] : memref<2x8xf32, #tpu.memory_space<vmem>>, vector<2x8xf32>
    tpu.vector_store %arg8[%c0_19, %c0_20], %32 {strides = array<i32>} : memref<2x8xf32, #tpu.memory_space<vmem>>, vector<2x8xf32>,
    %c0_21 = arith.constant 0 : index
    %c0_22 = arith.constant 0 : index
    %41 = vector.load %arg7[%c0_21, %c0_22] : memref<2x32xf32, #tpu.memory_space<vmem>>, vector<2x32xf32>
    tpu.vector_store %arg7[%c0_21, %c0_22], %38 {strides = array<i32>} : memref<2x32xf32, #tpu.memory_space<vmem>>, vector<2x32xf32>,
    return
  }
  func.func @transform_0(%arg0: i32) -> (i32, i32) {
    %c0_i32 = arith.constant 0 : i32
    %c0_i32_0 = arith.constant 0 : i32
    return %arg0, %c0_i32 : i32, i32
  }
  func.func @transform_1(%arg0: i32) -> (i32, i32) {
    %c0_i32 = arith.constant 0 : i32
    %c0_i32_0 = arith.constant 0 : i32
    return %arg0, %c0_i32 : i32, i32
  }
  func.func @transform_2(%arg0: i32) -> (i32, i32) {
    %c0_i32 = arith.constant 0 : i32
    %c0_i32_0 = arith.constant 0 : i32
    %c0_i32_1 = arith.constant 0 : i32
    return %c0_i32, %c0_i32_0 : i32, i32
  }
  func.func @transform_3(%arg0: i32) -> (i32, i32) {
    %c0_i32 = arith.constant 0 : i32
    %c0_i32_0 = arith.constant 0 : i32
    %c0_i32_1 = arith.constant 0 : i32
    return %c0_i32, %c0_i32_0 : i32, i32
  }
  func.func @transform_4(%arg0: i32) -> (i32, i32) {
    %c0_i32 = arith.constant 0 : i32
    %c0_i32_0 = arith.constant 0 : i32
    %c0_i32_1 = arith.constant 0 : i32
    return %c0_i32, %c0_i32_0 : i32, i32
  }
  func.func @transform_5(%arg0: i32) -> (i32, i32) {
    %c0_i32 = arith.constant 0 : i32
    %c0_i32_0 = arith.constant 0 : i32
    %c0_i32_1 = arith.constant 0 : i32
    return %c0_i32, %c0_i32_0 : i32, i32
  }
  func.func @transform_6(%arg0: i32) -> (i32, i32) {
    %c0_i32 = arith.constant 0 : i32
    %c0_i32_0 = arith.constant 0 : i32
    return %arg0, %c0_i32 : i32, i32
  }
  func.func @transform_7(%arg0: i32) -> (i32, i32) {
    %c0_i32 = arith.constant 0 : i32
    %c0_i32_0 = arith.constant 0 : i32
    return %arg0, %c0_i32 : i32, i32
  }
  func.func @transform_8(%arg0: i32) -> (i32, i32) {
    %c0_i32 = arith.constant 0 : i32
    %c0_i32_0 = arith.constant 0 : i32
    return %arg0, %c0_i32 : i32, i32
  }
}

</mosaic_0001>

<bundles_post_ra>
// kernel: tpu_custom_call.1
= control target key start
LH: loop header
LB: loop body
LE: loop exit
PB: predicated region body
PF: predicated region fallthrough
CT: control target
= control target key end

     0   :  { %14 = vsyncpa [#allocation3], 0  ;;  %v511_v1 = vmov 0.0   ;;  %vm512_vm0 = vmmov 0   ;;  %s637_s0 = inlined_call_operand.vmem [shape: bf16[2,48], index: 0, kind: input, shape index: {}]   ;;  %s638_s1 = inlined_call_operand.vmem [shape: bf16[16,32], index: 1, kind: input, shape index: {}]   ;;  %s639_s2 = inlined_call_operand.vmem [shape: bf16[32,32], index: 2, kind: input, shape index: {}]   ;;  %s640_s3 = inlined_call_operand.vmem [shape: bf16[48,32], index: 3, kind: input, shape index: {}]   ;;  %s641_s4 = inlined_call_operand.vmem [shape: f32[1,32], index: 4, kind: input, shape index: {}]   ;;  %s642_s5 = inlined_call_operand.vmem [shape: f32[1,32], index: 5, kind: input, shape index: {}]   ;;  %s643_s6 = inlined_call_operand.hbm [shape: f32[2,32], index: 6, kind: output, shape index: {0}]   ;;  %s644_s7 = inlined_call_operand.hbm [shape: f32[2,8], index: 7, kind: output, shape index: {1}]   ;;  %s645_s8 = inlined_call_operand.hbm [shape: f32[2,8], index: 8, kind: output, shape index: {2}]  }
   0x1   :  { %v430_v0 = vld [vmem:[%s640_s3 + $0x10] sm:$0xff]   ;;  %411 = vmatprep.subr.bf16.mxu1 %v511_v1  ;;  %v431_v2 = vld [vmem:[%s640_s3 + $0x8] sm:$0xff]   ;;  %403 = vmatprep.subr.bf16.mxu0 %v511_v1  ;;  %v434_v4 = vld [vmem:[%s639_s2] sm:$0xff]  }
   0x2   :  { %412 = vmatpush3.bf16.msra.mxu1 %v430_v0  ;;  %v432_v3 = vld [vmem:[%s639_s2 + $0x8] sm:$0xff]   ;;  %417 = vmatprep.mubr.msk.bf16.mxu1 %vm512_vm0, %v511_v1  ;;  %v578_v5 = vld [vmem:[%s638_s1] sm:$0xff]  }
   0x3   :  { %413 = vmatprep.subr.bf16.mxu1 %v511_v1  ;;  %407 = vmatprep.mubr.msk.bf16.mxu0 %vm512_vm0, %v511_v1  ;;  %v433_v6 = vld [vmem:[%s640_s3] sm:$0xff]  }
   0x4   :  { %404 = vmatpush3.bf16.msra.mxu0 %v432_v3 }
   0x5   :  { %405 = vmatprep.subr.bf16.mxu0 %v511_v1 }
   0x6   :  { %414 = vmatpush3.bf16.msra.mxu1 %v431_v2 }
   0x7   :  { %15 = vsyncpa [#allocation5], 0  ;;  %415 = vmatprep.subr.bf16.mxu1 %v511_v1  ;;  %vm52_vm1 = vcmask 261120   ;;  %v97_v7 = vld [vmem:[%s637_s0] sm:$0x1]  ;;  %vm129_vm2 = vcmask 392192   ;;  %v177_v10 = vlaneseq }
   0x8   :  { %406 = vmatpush3.bf16.msra.mxu0 %v434_v4  ;;  %v513_v8 = vmov 1966171168   ;;  %v390_v13 = vld [vmem:[%s641_s4] ss:$0 sm:$0xff]  ;;  %vm237_vm3 = vcmask 1041409   ;;  %vm240_vm4 = vcmask 58368  }
   0x9   :  { %v175_v9 = vunpack.c.l.s4 %v513_v8  ;;  %v588_v12 = vshrl.u32 %v177_v10, 7  ;;  %v395_v33 = vld [vmem:[%s642_s5] ss:$0 sm:$0xff]  ;;  %v228_v40 = vand.u32 127, %v177_v10  ;;  %v514_v48 = vmov 0   ;;  %s515_s4 = smov [#allocation4]  }
   0xa   :  { %416 = vmatpush3.bf16.msra.mxu1 %v433_v6  ;;  %429 = vset.pattern.permute.xlu0 %v514_v48  ;;  %s361_s5 = sshll.u32 %s515_s4, 4  ;;  %s516_s19 = smov [#allocation6]   ;;  %s362_s5 = int_to_ptr.vmem [resolvable:$true] %s361_s5 }
   0xb   :  { %408 = vmatmul.mubr.msk.bf16.vlgmr.msra.gmra.mxu0 %vm52_vm1, %v578_v5  ;;  %v176_v11 = vunpack.c.0.s8 %v175_v9  ;;  %v595_v22 = vsub.s32 0, %v588_v12  ;;  %v605_v42 = vsub.s32 %v228_v40, %v588_v12  ;;  %428 = vset.pattern.permute.xlu1 %v514_v48  ;;  %v251_v49 = vsub.s32 1, %v588_v12  ;;  %s371_s20 = sshll.u32 %s516_s19, 4  ;;  %s447_s21 = scalar_lea.vmem %s362_s5, 32  ;;  %s372_s20 = int_to_ptr.vmem [resolvable:$true] %s371_s20 }
   0xc   :  { %p448_p0 = scmp.ne.s32.totalorder %s362_s5, %s447_s21  ;;  %p452_p1 = scmp.lt.s32.totalorder %s362_s5, %s362_s5 }
   0xd   :  { %418 = vmatmul.mubr.msk.bf16.vlgmr.msra.gmra.mxu1 %vm129_vm2, %v97_v7  ;;  %v179_v15 = vsub.s32 %v176_v11, %v588_v12  ;;  %v299_v11 = vunpack.c.l.bf16 %v578_v5  ;;  %p453_p2 = scmp.lt.s32.totalorder %s447_s21, %s447_s21 }
   0xf   :  { %p454_p3 = por %p453_p2, %p452_p1 }
  0x11   :  { %p455_p4 = pnand %p454_p3, %p448_p0 }
  0xcb   :  { %v90_v14 = vpop.f32.mrf.mxu0 }
  0xcd   :  { %v167_v16 = vpop.f32.mrf.mxu1  ;;  %v409_v17 = vpop.f32.mrf.mxu0 }
  0xce   :  { %v168_v18 = vadd.f32 %v390_v13, %v167_v16 }
  0xcf   :  { %v419_v19 = vpop.f32.mrf.mxu1  ;;  %v93_v20 = vpop.f32.mrf.mxu0 }
  0xd0   :  { %v180_v21 = vrot.slane %v168_v18, %v179_v15 }
  0xd1   :  { %v170_v23 = vpop.f32.mrf.mxu1  ;;  %v410_v24 = vpop.f32.mrf.mxu0 }
  0xd2   :  { %v181_v25 = vcombine.high %v180_v21, %v180_v21  ;;  %v188_v26 = vrot.slane %v180_v21, %v179_v15 }
  0xd3   :  { %v420_v27 = vpop.f32.mrf.mxu1 }
  0xd4   :  { %v199_v28 = vrot.slane %v188_v26, %v595_v22  ;;  %v195_v29 = vrot.slane %v181_v25, %v179_v15 }
  0xd6   :  { %v206_v30 = vadd.f32 %v199_v28, %v90_v14  ;;  %v203_v31 = vrot.slane %v195_v29, %v595_v22  ;;  %v300_v14 = vunpack.c.h.bf16 %v578_v5 }
  0xd8   :  { %437 = vtanh.f32 %v206_v30  ;;  %v207_v32 = vadd.f32 %v203_v31, %v93_v20 }
  0xda   :  { %439 = vtanh.f32 %v207_v32 }
  0xe5   :  { %v438_v34 = vpop.eup %437 }
  0xe6   :  { %v217_v35 = vmul.f32 %v438_v34, %v395_v33 }
  0xe7   :  { %v440_v36 = vpop.eup %439 }
  0xe8   :  { %v219_v37 = vsel %vm52_vm1, %v217_v35, 0.0  ;;  %v218_v38 = vmul.f32 %v440_v36, %v395_v33 }
  0xe9   :  { %220 = vadd.xlane.f32.xlu0 %v219_v37 }
  0xea   :  { %v222_v39 = vsel %vm52_vm1, %v218_v38, 0.0 }
  0xed   :  { %223 = vadd.xlane.f32.xlu0 %v222_v39 }
 0x172   :  { %v221_v41 = vpop.xlane.xlu0 %220 }
 0x173   :  { %v232_v44 = vrot.slane %v221_v41, %v605_v42 }
 0x176   :  { %v224_v43 = vpop.xlane.xlu0 %223 }
 0x177   :  { %v236_v45 = vrot.slane %v224_v43, %v605_v42 }
 0x179   :  { %v238_v46 = vsel %vm237_vm3, %v236_v45, %v232_v44 }
 0x17a   :  { %v241_v47 = vsel %vm240_vm4, %v238_v46, -inf  ;;  %327 = vst.msk [vmem:[#allocation6] sm:$0x3] %vm240_vm4, %v238_v46 }
 0x17b   :  { %242 = vmax.xlane.f32.xlu1 %v241_v47 }
 0x204   :  { %v243_v50 = vpop.xlane.xlu1 %242 }
 0x205   :  { %v248_v51 = vrot.slane %v243_v50, %v595_v22  ;;  %v252_v52 = vrot.slane %v243_v50, %v251_v49 }
 0x207   :  { %v255_v53 = vsub.f32 %v221_v41, %v248_v51  ;;  %v256_v54 = vsub.f32 %v224_v43, %v252_v52 }
 0x209   :  { %v257_v55 = vmul.f32 1.442695, %v255_v53  ;;  %v259_v56 = vmul.f32 1.442695, %v256_v54 }
 0x20b   :  { %441 = vpow2.f32 %v257_v55 }
 0x20c   :  { %443 = vpow2.f32 %v259_v56 }
 0x218   :  { %v442_v57 = vpop.eup %441 }
 0x219   :  { %v444_v58 = vpop.eup %443  ;;  %264 = vperm.xlu1 %428, %v442_v57  }
 0x21a   :  { %267 = vperm.xlu0 %429, %v444_v58  }
 0x294   :  { %v265_v59 = vpop.permute.xlu1 %264 }
 0x295   :  { %v268_v60 = vpop.permute.xlu0 %267  ;;  %v272_v61 = vrot.slane %v265_v59, %v605_v42 }
 0x296   :  { %v276_v62 = vrot.slane %v268_v60, %v605_v42 }
 0x298   :  { %v277_v63 = vsel %vm237_vm3, %v276_v62, %v272_v61 }
 0x299   :  { %v279_v0 = vsel %vm240_vm4, %v277_v63, 0.0 }
 0x29a   :  { %280 = vadd.xlane.f32.xlu1 %v279_v0 }
 0x323   :  { %v281_v1 = vpop.xlane.xlu1 %280 }
 0x324   :  { %445 = vrcp.f32 %v281_v1 }
 0x331   :  { %v446_v2 = vpop.eup %445 }
 0x332   :  { %v283_v3 = vmul.f32 %v446_v2, %v281_v1 }
 0x334   :  { %v284_v4 = vsub.f32 2.0, %v283_v3 }
 0x336   :  { %v285_v6 = vmul.f32 %v446_v2, %v284_v4 }
 0x338   :  { %v290_v7 = vrot.slane %v285_v6, %v595_v22  ;;  %v294_v8 = vrot.slane %v285_v6, %v251_v49 }
 0x33a   :  { %v297_v9 = vmul.f32 %v442_v57, %v290_v7  ;;  %v298_v10 = vmul.f32 %v444_v58, %v294_v8 }
 0x33c   :  { %303 = vperm.xlu0 %429, %v297_v9  }
 0x340   :  { %308 = vperm.xlu0 %429, %v298_v10  }
 0x3b7   :  { %v304_v12 = vpop.permute.xlu0 %303 }
 0x3b8   :  { %v311_v13 = vmul.f32 %v304_v12, %v299_v11  ;;  %v331_v18 = vrot.slane %v304_v12, %v605_v42 }
 0x3ba   :  { %v313_v15 = vsel %vm52_vm1, %v311_v13, 0.0 }
 0x3bb   :  { %v314_v16 = vrot.slane %v313_v15, 4  ;;  %v309_v17 = vpop.permute.xlu0 %308 }
 0x3bc   :  { %v312_v19 = vmul.f32 %v309_v17, %v300_v14  ;;  %v335_v20 = vrot.slane %v309_v17, %v605_v42 }
 0x3bd   :  { %v315_v21 = vadd.f32 %v314_v16, %v313_v15 }
 0x3be   :  { %v320_v22 = vsel %vm52_vm1, %v312_v19, 0.0  ;;  %v336_v23 = vsel %vm237_vm3, %v335_v20, %v331_v18 }
 0x3bf   :  { %v316_v5 = vrot.slane %v315_v21, 2  ;;  %v321_v24 = vrot.slane %v320_v22, 4  ;;  %338 = vst.msk [vmem:[#allocation4] sm:$0x3] %vm240_vm4, %v336_v23 }
 0x3c0   :  { %458 = shalt.err (!%p455_p4)
}
 0x3c1   :  { %364 = dma.vmem_to_hbm [thread:$0]  %s362_s5, 32, %s644_s7, [#allocation5]   ;;  %v317_v25 = vadd.f32 %v316_v5, %v315_v21  ;;  %v322_v26 = vadd.f32 %v321_v24, %v320_v22 }
 0x3c2   :  { %s467_s24 = scalar_lea.vmem %s372_s20, 32  ;;  %p472_p6 = scmp.lt.s32.totalorder %s372_s20, %s372_s20 }
 0x3c3   :  { %p468_p5 = scmp.ne.s32.totalorder %s372_s20, %s467_s24  ;;  %p473_p7 = scmp.lt.s32.totalorder %s467_s24, %s467_s24 }
 0x3c5   :  { %p474_p8 = por %p473_p7, %p472_p6 }
 0x3c7   :  { %p475_p9 = pnand %p474_p8, %p468_p5 }
 0x3c9   :  { %478 = shalt.err (!%p475_p9)
}
 0x3ca   :  { %374 = dma.vmem_to_hbm [thread:$0]  %s372_s20, 32, %s645_s8, [#allocation5]   ;;  %v323_v27 = vrot.slane %v322_v26, 2  ;;  %v318_v29 = vrot.slane %v317_v25, 1  ;;  %vm343_vm5 = vcmask 254976  }
 0x3cb   :  { %s517_s27 = smov [#allocation2]  }
 0x3cc   :  { %v324_v28 = vadd.f32 %v323_v27, %v322_v26  ;;  %s351_s28 = sshll.u32 %s517_s27, 4  ;;  %v319_v31 = vadd.f32 %v318_v29, %v317_v25  ;;  %s352_s28 = int_to_ptr.vmem [resolvable:$true] %s351_s28 }
 0x3cd   :  { %s487_s7 = scalar_lea.vmem %s352_s28, 32  ;;  %p492_p11 = scmp.lt.s32.totalorder %s352_s28, %s352_s28 }
 0x3ce   :  { %v325_v30 = vrot.slane %v324_v28, 1  ;;  %p488_p10 = scmp.ne.s32.totalorder %s352_s28, %s487_s7  ;;  %p493_p12 = scmp.lt.s32.totalorder %s487_s7, %s487_s7 }
 0x3d0   :  { %v326_v32 = vadd.f32 %v325_v30, %v324_v28  ;;  %p494_p13 = por %p493_p12, %p492_p11 }
 0x3d2   :  { %v341_v33 = vsel %vm237_vm3, %v326_v32, %v319_v31  ;;  %p495_p0 = pnand %p494_p13, %p488_p10 }
 0x3d3   :  { %344 = vst.msk [vmem:[#allocation2] sm:$0x3] %vm343_vm5, %v341_v33 }
 0x3d4   :  { %498 = shalt.err (!%p495_p0)
}
 0x3d5   :  { %354 = dma.vmem_to_hbm [thread:$0]  %s352_s28, 32, %s643_s6, [#allocation3]  }
 0x3d6   :  { %507 = dma.done.wait [#allocation3], 32  }
 0x3d7   :  { %508 = vsyncadd [#allocation3], 4294967264 }
 0x3d8   :  { %509 = dma.done.wait [#allocation5], 64  }
 0x3d9   :  { %510 = vsyncadd [#allocation5], 4294967232 }
 0x3da   :  { %384 = vsyncpa [#allocation3], 1 }
 0x3db   :  { %385 = vsyncpa [#allocation5], 1 }

</bundles_post_ra>
